<compile_context>
chip_gen: v6e
topology: v6e:2x2x1
jax: 0.10.0
libtpu: 0.0.40
codegen_flags: <defaults>
</compile_context>

<pallas_src>
import jax
import jax.numpy as jnp
from jax.experimental import pallas as pl
from jax.experimental.pallas import tpu as pltpu

D_IN = 28 * 28          # 784
D_PAD = 7 * 128         # 896, lane-dense padding of the 784 feature dim


def _autoencoder_kernel(
    x_ref,
    w1_ref, b1_ref,
    w2_ref, b2_ref,
    w34_ref, b34_ref,
    w5_ref, b5_ref,
    w6_ref, b6_ref,
    o_ref,
):
    x = x_ref[...]                                                        # (TB, 896)

    # ---- encoder ----
    h = jnp.dot(x, w1_ref[...], preferred_element_type=jnp.float32) + b1_ref[...]
    h = jnp.maximum(h, 0.0)                                               # ReLU
    h = jnp.dot(h, w2_ref[...], preferred_element_type=jnp.float32) + b2_ref[...]
    h = jnp.maximum(h, 0.0)                                               # ReLU

    # ---- fused encoder L3 (no activation) + decoder L1 + ReLU ----
    h = jnp.dot(h, w34_ref[...], preferred_element_type=jnp.float32) + b34_ref[...]
    h = jnp.maximum(h, 0.0)                                               # ReLU

    # ---- decoder ----
    h = jnp.dot(h, w5_ref[...], preferred_element_type=jnp.float32) + b5_ref[...]
    h = jnp.maximum(h, 0.0)                                               # ReLU
    y = jnp.dot(h, w6_ref[...], preferred_element_type=jnp.float32) + b6_ref[...]
    y = jnp.tanh(y)                                                       # Tanh

    o_ref[...] = y.astype(o_ref.dtype)                                    # (TB, 896) lane-dense store


def autoencoder_forward(x, params, *, block_b=256):
    """x: (B, 784) float32.  params: list of (W, b) with W shaped (in, out), b shaped (1, out)."""
    B, D = x.shape
    assert D == D_IN

    (w1, b1), (w2, b2), (w3, b3), (w4, b4), (w5, b5), (w6, b6) = params

    # Fuse encoder layer 3 into decoder layer 1 (no activation between them).
    w34 = jnp.dot(w3, w4, preferred_element_type=jnp.float32)             # (64, 64)
    b34 = jnp.dot(b3, w4, preferred_element_type=jnp.float32) + b4        # (1, 64)

    # Zero-pad the 784 feature dim to 896 (7 * 128) for lane-dense I/O.
    w1p = jnp.zeros((D_PAD, w1.shape[1]), w1.dtype).at[:D_IN, :].set(w1)  # (896, 128)
    w6p = jnp.zeros((w6.shape[0], D_PAD), w6.dtype).at[:, :D_IN].set(w6)  # (128, 896)
    b6p = jnp.zeros((1, D_PAD), b6.dtype).at[:, :D_IN].set(b6)            # (1, 896)

    # Batch tile: multiple of 8, capped at block_b; pad the batch to a multiple of it.
    tb = min(block_b, max(8, int(pl.cdiv(B, 8)) * 8))
    b_pad = int(pl.cdiv(B, tb)) * tb
    xp = jnp.zeros((b_pad, D_PAD), x.dtype).at[:B, :D_IN].set(x)

    flat = [w1p, b1, w2, b2, w34, b34, w5, b5, w6p, b6p]

    # Weights/biases: full-array blocks with a constant index_map -> resident in
    # VMEM across all batch grid steps (no re-fetch).
    def const_spec(a):
        return pl.BlockSpec(a.shape, lambda i: tuple(0 for _ in a.shape))

    out = pl.pallas_call(
        _autoencoder_kernel,
        out_shape=jax.ShapeDtypeStruct((b_pad, D_PAD), jnp.float32),
        grid=(b_pad // tb,),
        in_specs=[pl.BlockSpec((tb, D_PAD), lambda i: (i, 0))]
        + [const_spec(a) for a in flat],
        out_specs=pl.BlockSpec((tb, D_PAD), lambda i: (i, 0)),
        compiler_params=pltpu.CompilerParams(
            dimension_semantics=("parallel",),
        ),
    )(xp, *flat)

    return out[:B, :D_IN]


def init_params(key):
    """Deterministic init mirroring nn.Linear shapes; weights stored as (in, out)."""
    dims = [(28 * 28, 128), (128, 64), (64, 20),      # encoder
            (20, 64), (64, 128), (128, 28 * 28)]      # decoder
    params = []
    for (fan_in, fan_out) in dims:
        key, kw, kb = jax.random.split(key, 3)
        bound = 1.0 / jnp.sqrt(fan_in)
        w = jax.random.uniform(kw, (fan_in, fan_out), jnp.float32, -bound, bound)
        b = jax.random.uniform(kb, (1, fan_out), jnp.float32, -bound, bound)
        params.append((w, b))
    return params


def reference_forward(x, params):
    h = x
    # encoder
    h = jnp.maximum(h @ params[0][0] + params[0][1], 0.0)
    h = jnp.maximum(h @ params[1][0] + params[1][1], 0.0)
    h = h @ params[2][0] + params[2][1]
    # decoder
    h = jnp.maximum(h @ params[3][0] + params[3][1], 0.0)
    h = jnp.maximum(h @ params[4][0] + params[4][1], 0.0)
    h = jnp.tanh(h @ params[5][0] + params[5][1])
    return h


if __name__ == "__main__":
    key = jax.random.PRNGKey(0)
    key, kx1, kx2 = jax.random.split(key, 3)
    params = init_params(key)

    # Small-batch check (single grid step).
    B1 = 8
    x1 = jax.random.normal(kx1, (B1, D_IN), jnp.float32)
    out1 = jax.block_until_ready(autoencoder_forward(x1, params))
    ref1 = reference_forward(x1, params)
    assert out1.shape == (B1, D_IN)
    assert jnp.allclose(out1, ref1, atol=1e-4, rtol=1e-4), "mismatch vs JAX reference (B=8)"

    # Multi-tile check: exercises batch padding + pipelined grid (200 -> 4 tiles of 64).
    B2 = 200
    x2 = jax.random.normal(kx2, (B2, D_IN), jnp.float32)
    out2 = jax.block_until_ready(autoencoder_forward(x2, params, block_b=64))
    ref2 = reference_forward(x2, params)
    assert out2.shape == (B2, D_IN)
    assert jnp.allclose(out2, ref2, atol=1e-4, rtol=1e-4), "mismatch vs JAX reference (B=200)"

    print("KERNEL_OK")
</pallas_src>

<mosaic_0001>
module attributes {stable_mosaic.version = 11 : i64} {
  func.func @_autoencoder_kernel(%arg0: i32, %arg1: memref<8x896xf32, #tpu.memory_space<vmem>>, %arg2: memref<896x128xf32, #tpu.memory_space<vmem>>, %arg3: memref<1x128xf32, #tpu.memory_space<vmem>>, %arg4: memref<128x64xf32, #tpu.memory_space<vmem>>, %arg5: memref<1x64xf32, #tpu.memory_space<vmem>>, %arg6: memref<64x64xf32, #tpu.memory_space<vmem>>, %arg7: memref<1x64xf32, #tpu.memory_space<vmem>>, %arg8: memref<64x128xf32, #tpu.memory_space<vmem>>, %arg9: memref<1x128xf32, #tpu.memory_space<vmem>>, %arg10: memref<128x896xf32, #tpu.memory_space<vmem>>, %arg11: memref<1x896xf32, #tpu.memory_space<vmem>>, %arg12: memref<8x896xf32, #tpu.memory_space<vmem>>) attributes {dimension_semantics = [#tpu.dimension_semantics<parallel>], iteration_bounds = array<i64: 1>, scalar_prefetch = 0 : i64, scratch_operands = 0 : i64, tpu.core_type = #tpu.core_type<tc>, window_params = [{transform_indices = @transform_0, window_bounds = array<i64: 8, 896>}, {pipeline_mode = #tpu.pipeline_mode<synchronous>, transform_indices = @transform_1, window_bounds = array<i64: 896, 128>}, {pipeline_mode = #tpu.pipeline_mode<synchronous>, transform_indices = @transform_2, window_bounds = array<i64: 1, 128>}, {pipeline_mode = #tpu.pipeline_mode<synchronous>, transform_indices = @transform_3, window_bounds = array<i64: 128, 64>}, {pipeline_mode = #tpu.pipeline_mode<synchronous>, transform_indices = @transform_4, window_bounds = array<i64: 1, 64>}, {pipeline_mode = #tpu.pipeline_mode<synchronous>, transform_indices = @transform_5, window_bounds = array<i64: 64, 64>}, {pipeline_mode = #tpu.pipeline_mode<synchronous>, transform_indices = @transform_6, window_bounds = array<i64: 1, 64>}, {pipeline_mode = #tpu.pipeline_mode<synchronous>, transform_indices = @transform_7, window_bounds = array<i64: 64, 128>}, {pipeline_mode = #tpu.pipeline_mode<synchronous>, transform_indices = @transform_8, window_bounds = array<i64: 1, 128>}, {pipeline_mode = #tpu.pipeline_mode<synchronous>, transform_indices = @transform_9, window_bounds = array<i64: 128, 896>}, {pipeline_mode = #tpu.pipeline_mode<synchronous>, transform_indices = @transform_10, window_bounds = array<i64: 1, 896>}, {transform_indices = @transform_11, window_bounds = array<i64: 8, 896>}]} {
    %c0 = arith.constant 0 : index
    %c0_0 = arith.constant 0 : index
    %0 = vector.load %arg1[%c0, %c0_0] : memref<8x896xf32, #tpu.memory_space<vmem>>, vector<8x896xf32>
    %c0_1 = arith.constant 0 : index
    %c0_2 = arith.constant 0 : index
    %1 = vector.load %arg2[%c0_1, %c0_2] : memref<896x128xf32, #tpu.memory_space<vmem>>, vector<896x128xf32>
    %cst = arith.constant dense<0.000000e+00> : vector<8x128xf32>
    %2 = tpu.matmul %0, %1, %cst {dimension_numbers = #tpu.dot_dimension_numbers<[1], [0], [0], [1], [0, 0, 1, 1], [], []>} : vector<8x896xf32>, vector<896x128xf32>, vector<8x128xf32> -> vector<8x128xf32>
    %c0_3 = arith.constant 0 : index
    %c0_4 = arith.constant 0 : index
    %3 = vector.load %arg3[%c0_3, %c0_4] : memref<1x128xf32, #tpu.memory_space<vmem>>, vector<1x128xf32>
    %4 = vector.broadcast %3 : vector<1x128xf32> to vector<8x128xf32>
    %5 = arith.addf %2, %4 : vector<8x128xf32>
    %cst_5 = arith.constant 0.000000e+00 : f32
    %6 = vector.broadcast %cst_5 : f32 to vector<8x128xf32>
    %7 = arith.maximumf %5, %6 : vector<8x128xf32>
    %c0_6 = arith.constant 0 : index
    %c0_7 = arith.constant 0 : index
    %8 = vector.load %arg4[%c0_6, %c0_7] : memref<128x64xf32, #tpu.memory_space<vmem>>, vector<128x64xf32>
    %cst_8 = arith.constant dense<0.000000e+00> : vector<8x64xf32>
    %9 = tpu.matmul %7, %8, %cst_8 {dimension_numbers = #tpu.dot_dimension_numbers<[1], [0], [0], [1], [0, 0, 1, 1], [], []>} : vector<8x128xf32>, vector<128x64xf32>, vector<8x64xf32> -> vector<8x64xf32>
    %c0_9 = arith.constant 0 : index
    %c0_10 = arith.constant 0 : index
    %10 = vector.load %arg5[%c0_9, %c0_10] : memref<1x64xf32, #tpu.memory_space<vmem>>, vector<1x64xf32>
    %11 = vector.broadcast %10 : vector<1x64xf32> to vector<8x64xf32>
    %12 = arith.addf %9, %11 : vector<8x64xf32>
    %cst_11 = arith.constant 0.000000e+00 : f32
    %13 = vector.broadcast %cst_11 : f32 to vector<8x64xf32>
    %14 = arith.maximumf %12, %13 : vector<8x64xf32>
    %c0_12 = arith.constant 0 : index
    %c0_13 = arith.constant 0 : index
    %15 = vector.load %arg6[%c0_12, %c0_13] : memref<64x64xf32, #tpu.memory_space<vmem>>, vector<64x64xf32>
    %cst_14 = arith.constant dense<0.000000e+00> : vector<8x64xf32>
    %16 = tpu.matmul %14, %15, %cst_14 {dimension_numbers = #tpu.dot_dimension_numbers<[1], [0], [0], [1], [0, 0, 1, 1], [], []>} : vector<8x64xf32>, vector<64x64xf32>, vector<8x64xf32> -> vector<8x64xf32>
    %c0_15 = arith.constant 0 : index
    %c0_16 = arith.constant 0 : index
    %17 = vector.load %arg7[%c0_15, %c0_16] : memref<1x64xf32, #tpu.memory_space<vmem>>, vector<1x64xf32>
    %18 = vector.broadcast %17 : vector<1x64xf32> to vector<8x64xf32>
    %19 = arith.addf %16, %18 : vector<8x64xf32>
    %cst_17 = arith.constant 0.000000e+00 : f32
    %20 = vector.broadcast %cst_17 : f32 to vector<8x64xf32>
    %21 = arith.maximumf %19, %20 : vector<8x64xf32>
    %c0_18 = arith.constant 0 : index
    %c0_19 = arith.constant 0 : index
    %22 = vector.load %arg8[%c0_18, %c0_19] : memref<64x128xf32, #tpu.memory_space<vmem>>, vector<64x128xf32>
    %cst_20 = arith.constant dense<0.000000e+00> : vector<8x128xf32>
    %23 = tpu.matmul %21, %22, %cst_20 {dimension_numbers = #tpu.dot_dimension_numbers<[1], [0], [0], [1], [0, 0, 1, 1], [], []>} : vector<8x64xf32>, vector<64x128xf32>, vector<8x128xf32> -> vector<8x128xf32>
    %c0_21 = arith.constant 0 : index
    %c0_22 = arith.constant 0 : index
    %24 = vector.load %arg9[%c0_21, %c0_22] : memref<1x128xf32, #tpu.memory_space<vmem>>, vector<1x128xf32>
    %25 = vector.broadcast %24 : vector<1x128xf32> to vector<8x128xf32>
    %26 = arith.addf %23, %25 : vector<8x128xf32>
    %cst_23 = arith.constant 0.000000e+00 : f32
    %27 = vector.broadcast %cst_23 : f32 to vector<8x128xf32>
    %28 = arith.maximumf %26, %27 : vector<8x128xf32>
    %c0_24 = arith.constant 0 : index
    %c0_25 = arith.constant 0 : index
    %29 = vector.load %arg10[%c0_24, %c0_25] : memref<128x896xf32, #tpu.memory_space<vmem>>, vector<128x896xf32>
    %cst_26 = arith.constant dense<0.000000e+00> : vector<8x896xf32>
    %30 = tpu.matmul %28, %29, %cst_26 {dimension_numbers = #tpu.dot_dimension_numbers<[1], [0], [0], [1], [0, 0, 1, 1], [], []>} : vector<8x128xf32>, vector<128x896xf32>, vector<8x896xf32> -> vector<8x896xf32>
    %c0_27 = arith.constant 0 : index
    %c0_28 = arith.constant 0 : index
    %31 = vector.load %arg11[%c0_27, %c0_28] : memref<1x896xf32, #tpu.memory_space<vmem>>, vector<1x896xf32>
    %32 = vector.broadcast %31 : vector<1x896xf32> to vector<8x896xf32>
    %33 = arith.addf %30, %32 : vector<8x896xf32>
    %34 = math.tanh %33 : vector<8x896xf32>
    %c0_29 = arith.constant 0 : index
    %c0_30 = arith.constant 0 : index
    %35 = vector.load %arg12[%c0_29, %c0_30] : memref<8x896xf32, #tpu.memory_space<vmem>>, vector<8x896xf32>
    tpu.vector_store %arg12[%c0_29, %c0_30], %34 {strides = array<i32>} : memref<8x896xf32, #tpu.memory_space<vmem>>, vector<8x896xf32>,
    return
  }
  func.func @transform_0(%arg0: i32) -> (i32, i32) {
    %c0_i32 = arith.constant 0 : i32
    %c0_i32_0 = arith.constant 0 : i32
    return %arg0, %c0_i32 : i32, i32
  }
  func.func @transform_1(%arg0: i32) -> (i32, i32) {
    %c0_i32 = arith.constant 0 : i32
    %c0_i32_0 = arith.constant 0 : i32
    %c0_i32_1 = arith.constant 0 : i32
    return %c0_i32, %c0_i32_0 : i32, i32
  }
  func.func @transform_2(%arg0: i32) -> (i32, i32) {
    %c0_i32 = arith.constant 0 : i32
    %c0_i32_0 = arith.constant 0 : i32
    %c0_i32_1 = arith.constant 0 : i32
    return %c0_i32, %c0_i32_0 : i32, i32
  }
  func.func @transform_3(%arg0: i32) -> (i32, i32) {
    %c0_i32 = arith.constant 0 : i32
    %c0_i32_0 = arith.constant 0 : i32
    %c0_i32_1 = arith.constant 0 : i32
    return %c0_i32, %c0_i32_0 : i32, i32
  }
  func.func @transform_4(%arg0: i32) -> (i32, i32) {
    %c0_i32 = arith.constant 0 : i32
    %c0_i32_0 = arith.constant 0 : i32
    %c0_i32_1 = arith.constant 0 : i32
    return %c0_i32, %c0_i32_0 : i32, i32
  }
  func.func @transform_5(%arg0: i32) -> (i32, i32) {
    %c0_i32 = arith.constant 0 : i32
    %c0_i32_0 = arith.constant 0 : i32
    %c0_i32_1 = arith.constant 0 : i32
    return %c0_i32, %c0_i32_0 : i32, i32
  }
  func.func @transform_6(%arg0: i32) -> (i32, i32) {
    %c0_i32 = arith.constant 0 : i32
    %c0_i32_0 = arith.constant 0 : i32
    %c0_i32_1 = arith.constant 0 : i32
    return %c0_i32, %c0_i32_0 : i32, i32
  }
  func.func @transform_7(%arg0: i32) -> (i32, i32) {
    %c0_i32 = arith.constant 0 : i32
    %c0_i32_0 = arith.constant 0 : i32
    %c0_i32_1 = arith.constant 0 : i32
    return %c0_i32, %c0_i32_0 : i32, i32
  }
  func.func @transform_8(%arg0: i32) -> (i32, i32) {
    %c0_i32 = arith.constant 0 : i32
    %c0_i32_0 = arith.constant 0 : i32
    %c0_i32_1 = arith.constant 0 : i32
    return %c0_i32, %c0_i32_0 : i32, i32
  }
  func.func @transform_9(%arg0: i32) -> (i32, i32) {
    %c0_i32 = arith.constant 0 : i32
    %c0_i32_0 = arith.constant 0 : i32
    %c0_i32_1 = arith.constant 0 : i32
    return %c0_i32, %c0_i32_0 : i32, i32
  }
  func.func @transform_10(%arg0: i32) -> (i32, i32) {
    %c0_i32 = arith.constant 0 : i32
    %c0_i32_0 = arith.constant 0 : i32
    %c0_i32_1 = arith.constant 0 : i32
    return %c0_i32, %c0_i32_0 : i32, i32
  }
  func.func @transform_11(%arg0: i32) -> (i32, i32) {
    %c0_i32 = arith.constant 0 : i32
    %c0_i32_0 = arith.constant 0 : i32
    return %arg0, %c0_i32 : i32, i32
  }
}

</mosaic_0001>

<bundles_post_ra>
// kernel: tpu_custom_call.1
= control target key start
LH: loop header
LB: loop body
LE: loop exit
PB: predicated region body
PF: predicated region fallthrough
CT: control target
= control target key end

     0   :  { %16 = vsyncpa [#allocation3], 0  ;;  %s1916_s0 = inlined_call_operand.vmem [shape: f32[8,896], index: 0, kind: input, shape index: {}]   ;;  %s1917_s1 = inlined_call_operand.hbm [shape: f32[896,128], index: 1, kind: input, shape index: {}]   ;;  %s1918_s2 = inlined_call_operand.vmem [shape: f32[1,128], index: 2, kind: input, shape index: {}]   ;;  %s1919_s3 = inlined_call_operand.vmem [shape: f32[128,64], index: 3, kind: input, shape index: {}]   ;;  %s1920_s4 = inlined_call_operand.vmem [shape: f32[1,64], index: 4, kind: input, shape index: {}]   ;;  %s1921_s5 = inlined_call_operand.vmem [shape: f32[64,64], index: 5, kind: input, shape index: {}]   ;;  %s1922_s6 = inlined_call_operand.vmem [shape: f32[1,64], index: 6, kind: input, shape index: {}]   ;;  %s1923_s7 = inlined_call_operand.vmem [shape: f32[64,128], index: 7, kind: input, shape index: {}]   ;;  %s1924_s8 = inlined_call_operand.vmem [shape: f32[1,128], index: 8, kind: input, shape index: {}]   ;;  %s1925_s9 = inlined_call_operand.hbm [shape: f32[128,896], index: 9, kind: input, shape index: {}]   ;;  %s1926_s10 = inlined_call_operand.vmem [shape: f32[1,896], index: 10, kind: input, shape index: {}]   ;;  %s1927_s11 = inlined_call_operand.hbm [shape: f32[8,896], index: 11, kind: output, shape index: {}]  }
   0x1   :  { %17 = vsyncpa [#allocation6], 0 }
   0x2   :  { %18 = vsyncpa [#allocation4], 0  ;;  %s1621_s17 = smov [#allocation2]  }
   0x3   :  { %s26_s18 = sshll.u32 %s1621_s17, 4  ;;  %s27_s18 = int_to_ptr.vmem [resolvable:$true] %s26_s18 }
   0x4   :  { %s1563_s19 = scalar_lea.vmem %s27_s18, 14336  ;;  %p1568_p1 = scmp.lt.s32.totalorder %s27_s18, %s27_s18 }
   0x5   :  { %p1564_p0 = scmp.ne.s32.totalorder %s27_s18, %s1563_s19  ;;  %p1569_p2 = scmp.lt.s32.totalorder %s1563_s19, %s1563_s19 }
   0x7   :  { %p1570_p3 = por %p1569_p2, %p1568_p1 }
   0x9   :  { %p1571_p4 = pnand %p1570_p3, %p1564_p0 }
   0xb   :  { %1574 = shalt.err (!%p1571_p4)
}
   0xc   :  { %s1622_s20 = smov 128   ;;  %s1623_s21 = smov 8  }
   0xd   :  { %32 = dma.hbm_to_vmem [thread:$0]  %s1917_s1, 14336, %s27_s18, [#allocation3], %s1622_s20, %s1622_s20, %s1623_s21  }
   0xe   :  { %s1624_s24 = smov [#allocation5]  }
   0xf   :  { %s52_s25 = sshll.u32 %s1624_s24, 4  ;;  %s53_s25 = int_to_ptr.vmem [resolvable:$true] %s52_s25 }
  0x10   :  { %s1583_s26 = scalar_lea.vmem %s53_s25, 14336  ;;  %p1588_p6 = scmp.lt.s32.totalorder %s53_s25, %s53_s25 }
  0x11   :  { %p1584_p5 = scmp.ne.s32.totalorder %s53_s25, %s1583_s26  ;;  %p1589_p7 = scmp.lt.s32.totalorder %s1583_s26, %s1583_s26 }
  0x13   :  { %p1590_p8 = por %p1589_p7, %p1588_p6 }
  0x15   :  { %p1591_p9 = pnand %p1590_p8, %p1584_p5 }
  0x17   :  { %1594 = shalt.err (!%p1591_p9)
}
  0x18   :  { %s1625_s27 = smov 896   ;;  %s1626_s28 = smov 56  }
  0x19   :  { %58 = dma.hbm_to_vmem [thread:$0]  %s1925_s9, 14336, %s53_s25, [#allocation6], %s1625_s27, %s1625_s27, %s1626_s28  }
  0x1a   :  { %1615 = dma.done.wait [#allocation3], 14336  }
  0x1b   :  { %1616 = vsyncadd [#allocation3], 4294952960 }
  0x1c   :  { %1617 = dma.done.wait [#allocation6], 14336  }
  0x1d   :  { %1618 = vsyncadd [#allocation6], 4294952960  ;;  %v105_v0 = vld [vmem:[#allocation2 + $0xf8] sm:$0xff]  ;;  %v104_v2 = vld [vmem:[#allocation2 + $0xf0] sm:$0xff]  ;;  %vm1628_vm0 = vmmov 0   ;;  %vm583_vm1 = vcmask 523264  }
  0x1e   :  { %v89_v1 = vld [vmem:[#allocation2 + $0x78] sm:$0xff]  ;;  %1215 = vmatprep.subr.mxu0 %v105_v0  ;;  %v88_v4 = vld [vmem:[#allocation2 + $0x70] sm:$0xff]  ;;  %v103_v6 = vld [vmem:[#allocation2 + $0xe8] sm:$0xff] }
  0x1f   :  { %v137_v3 = vld [vmem:[#allocation2 + $0x1f8] sm:$0xff]  ;;  %1216 = vmatpush3.msra.mxu0 %v89_v1  ;;  %v136_v7 = vld [vmem:[#allocation2 + $0x1f0] sm:$0xff]  ;;  %v87_v8 = vld [vmem:[#allocation2 + $0x68] sm:$0xff] }
  0x20   :  { %v121_v5 = vld [vmem:[#allocation2 + $0x178] sm:$0xff]  ;;  %1250 = vmatprep.subr.mxu1 %v137_v3  ;;  %1217 = vmatprep.subr.mxu0 %v104_v2  ;;  %v120_v9 = vld [vmem:[#allocation2 + $0x170] sm:$0xff]  ;;  %v135_v10 = vld [vmem:[#allocation2 + $0x1e8] sm:$0xff] }
  0x21   :  { %1251 = vmatpush3.msra.mxu1 %v121_v5  ;;  %1218 = vmatpush3.msra.mxu0 %v88_v4  ;;  %v102_v11 = vld [vmem:[#allocation2 + $0xe0] sm:$0xff]  ;;  %v119_v12 = vld [vmem:[#allocation2 + $0x168] sm:$0xff]  ;;  %v101_v15 = vld [vmem:[#allocation2 + $0xd8] sm:$0xff] }
  0x22   :  { %1252 = vmatprep.subr.mxu1 %v136_v7  ;;  %1219 = vmatprep.subr.mxu0 %v103_v6  ;;  %v86_v13 = vld [vmem:[#allocation2 + $0x60] sm:$0xff]  ;;  %v85_v17 = vld [vmem:[#allocation2 + $0x58] sm:$0xff]  ;;  %v100_v19 = vld [vmem:[#allocation2 + $0xd0] sm:$0xff] }
  0x23   :  { %1253 = vmatpush3.msra.mxu1 %v120_v9  ;;  %v134_v14 = vld [vmem:[#allocation2 + $0x1e0] sm:$0xff]  ;;  %1220 = vmatpush3.msra.mxu0 %v87_v8  ;;  %v133_v18 = vld [vmem:[#allocation2 + $0x1d8] sm:$0xff]  ;;  %v84_v21 = vld [vmem:[#allocation2 + $0x50] sm:$0xff] }
  0x24   :  { %1254 = vmatprep.subr.mxu1 %v135_v10  ;;  %v118_v16 = vld [vmem:[#allocation2 + $0x160] sm:$0xff]  ;;  %1221 = vmatprep.subr.mxu0 %v102_v11  ;;  %v117_v20 = vld [vmem:[#allocation2 + $0x158] sm:$0xff]  ;;  %v132_v22 = vld [vmem:[#allocation2 + $0x1d0] sm:$0xff]  ;;  %v1627_v11 = vmov 0.0  }
  0x25   :  { %1255 = vmatpush3.msra.mxu1 %v119_v12  ;;  %1222 = vmatpush3.msra.mxu0 %v86_v13  ;;  %v99_v23 = vld [vmem:[#allocation2 + $0xc8] sm:$0xff]  ;;  %v116_v24 = vld [vmem:[#allocation2 + $0x150] sm:$0xff]  ;;  %v98_v27 = vld [vmem:[#allocation2 + $0xc0] sm:$0xff] }
  0x26   :  { %1256 = vmatprep.subr.mxu1 %v134_v14  ;;  %1223 = vmatprep.subr.mxu0 %v101_v15  ;;  %v83_v25 = vld [vmem:[#allocation2 + $0x48] sm:$0xff]  ;;  %v82_v29 = vld [vmem:[#allocation2 + $0x40] sm:$0xff]  ;;  %v97_v31 = vld [vmem:[#allocation2 + $0xb8] sm:$0xff] }
  0x27   :  { %1257 = vmatpush3.msra.mxu1 %v118_v16  ;;  %1224 = vmatpush3.msra.mxu0 %v85_v17  ;;  %v131_v26 = vld [vmem:[#allocation2 + $0x1c8] sm:$0xff]  ;;  %v130_v30 = vld [vmem:[#allocation2 + $0x1c0] sm:$0xff]  ;;  %v81_v33 = vld [vmem:[#allocation2 + $0x38] sm:$0xff] }
  0x28   :  { %1258 = vmatprep.subr.mxu1 %v133_v18  ;;  %1225 = vmatprep.subr.mxu0 %v100_v19  ;;  %v115_v28 = vld [vmem:[#allocation2 + $0x148] sm:$0xff]  ;;  %v114_v32 = vld [vmem:[#allocation2 + $0x140] sm:$0xff]  ;;  %v129_v34 = vld [vmem:[#allocation2 + $0x1b8] sm:$0xff] }
  0x29   :  { %1259 = vmatpush3.msra.mxu1 %v117_v20  ;;  %1226 = vmatpush3.msra.mxu0 %v84_v21  ;;  %v96_v35 = vld [vmem:[#allocation2 + $0xb0] sm:$0xff]  ;;  %v113_v36 = vld [vmem:[#allocation2 + $0x138] sm:$0xff]  ;;  %v95_v39 = vld [vmem:[#allocation2 + $0xa8] sm:$0xff] }
  0x2a   :  { %1260 = vmatprep.subr.mxu1 %v132_v22  ;;  %1227 = vmatprep.subr.mxu0 %v99_v23  ;;  %v80_v37 = vld [vmem:[#allocation2 + $0x30] sm:$0xff]  ;;  %v79_v41 = vld [vmem:[#allocation2 + $0x28] sm:$0xff]  ;;  %v94_v43 = vld [vmem:[#allocation2 + $0xa0] sm:$0xff] }
  0x2b   :  { %1261 = vmatpush3.msra.mxu1 %v116_v24  ;;  %1228 = vmatpush3.msra.mxu0 %v83_v25  ;;  %v128_v38 = vld [vmem:[#allocation2 + $0x1b0] sm:$0xff]  ;;  %v127_v42 = vld [vmem:[#allocation2 + $0x1a8] sm:$0xff]  ;;  %v78_v45 = vld [vmem:[#allocation2 + $0x20] sm:$0xff] }
  0x2c   :  { %1262 = vmatprep.subr.mxu1 %v131_v26  ;;  %1229 = vmatprep.subr.mxu0 %v98_v27  ;;  %v112_v40 = vld [vmem:[#allocation2 + $0x130] sm:$0xff]  ;;  %v111_v44 = vld [vmem:[#allocation2 + $0x128] sm:$0xff]  ;;  %v126_v46 = vld [vmem:[#allocation2 + $0x1a0] sm:$0xff] }
  0x2d   :  { %1263 = vmatpush3.msra.mxu1 %v115_v28  ;;  %1230 = vmatpush3.msra.mxu0 %v82_v29  ;;  %v93_v47 = vld [vmem:[#allocation2 + $0x98] sm:$0xff]  ;;  %v110_v48 = vld [vmem:[#allocation2 + $0x120] sm:$0xff]  ;;  %v92_v51 = vld [vmem:[#allocation2 + $0x90] sm:$0xff] }
  0x2e   :  { %1264 = vmatprep.subr.mxu1 %v130_v30  ;;  %1231 = vmatprep.subr.mxu0 %v97_v31  ;;  %v77_v49 = vld [vmem:[#allocation2 + $0x18] sm:$0xff]  ;;  %v76_v53 = vld [vmem:[#allocation2 + $0x10] sm:$0xff]  ;;  %v91_v55 = vld [vmem:[#allocation2 + $0x88] sm:$0xff] }
  0x2f   :  { %1265 = vmatpush3.msra.mxu1 %v114_v32  ;;  %1232 = vmatpush3.msra.mxu0 %v81_v33  ;;  %v125_v50 = vld [vmem:[#allocation2 + $0x198] sm:$0xff]  ;;  %v124_v54 = vld [vmem:[#allocation2 + $0x190] sm:$0xff]  ;;  %v75_v57 = vld [vmem:[#allocation2 + $0x8] sm:$0xff] }
  0x30   :  { %1266 = vmatprep.subr.mxu1 %v129_v34  ;;  %1233 = vmatprep.subr.mxu0 %v96_v35  ;;  %v109_v52 = vld [vmem:[#allocation2 + $0x118] sm:$0xff]  ;;  %v108_v56 = vld [vmem:[#allocation2 + $0x110] sm:$0xff]  ;;  %v123_v58 = vld [vmem:[#allocation2 + $0x188] sm:$0xff] }
  0x31   :  { %1267 = vmatpush3.msra.mxu1 %v113_v36  ;;  %1234 = vmatpush3.msra.mxu0 %v80_v37  ;;  %v90_v59 = vld [vmem:[#allocation2 + $0x80] sm:$0xff]  ;;  %v68_v60 = vld [vmem:[%s1916_s0 + $0x8] sm:$0xff]  ;;  %v169_v1 = vld [vmem:[#allocation2 + $0x2f8] sm:$0xff] }
  0x32   :  { %1268 = vmatprep.subr.mxu1 %v128_v38  ;;  %1235 = vmatprep.subr.mxu0 %v95_v39  ;;  %v74_v61 = vld [vmem:[#allocation2] sm:$0xff]  ;;  %v107_v62 = vld [vmem:[#allocation2 + $0x108] sm:$0xff]  ;;  %v70_v3 = vld [vmem:[%s1916_s0 + $0x18] sm:$0xff] }
  0x33   :  { %1269 = vmatpush3.msra.mxu1 %v112_v40  ;;  %1236 = vmatpush3.msra.mxu0 %v79_v41  ;;  %v67_v63 = vld [vmem:[%s1916_s0] sm:$0xff]  ;;  %v153_v4 = vld [vmem:[#allocation2 + $0x278] sm:$0xff]  ;;  %v69_v5 = vld [vmem:[%s1916_s0 + $0x10] sm:$0xff] }
  0x34   :  { %1270 = vmatprep.subr.mxu1 %v127_v42  ;;  %1237 = vmatprep.subr.mxu0 %v94_v43  ;;  %v122_v0 = vld [vmem:[#allocation2 + $0x180] sm:$0xff]  ;;  %v168_v6 = vld [vmem:[#allocation2 + $0x2f0] sm:$0xff]  ;;  %v167_v8 = vld [vmem:[#allocation2 + $0x2e8] sm:$0xff] }
  0x35   :  { %1271 = vmatpush3.msra.mxu1 %v111_v44  ;;  %1238 = vmatpush3.msra.mxu0 %v78_v45  ;;  %v106_v2 = vld [vmem:[#allocation2 + $0x100] sm:$0xff]  ;;  %v152_v7 = vld [vmem:[#allocation2 + $0x270] sm:$0xff]  ;;  %v185_v9 = vld [vmem:[#allocation2 + $0x378] sm:$0xff] }
  0x36   :  { %1272 = vmatprep.subr.mxu1 %v126_v46  ;;  %1239 = vmatprep.subr.mxu0 %v93_v47  ;;  %v151_v10 = vld [vmem:[#allocation2 + $0x268] sm:$0xff]  ;;  %v166_v12 = vld [vmem:[#allocation2 + $0x2e0] sm:$0xff]  ;;  %v184_v13 = vld [vmem:[#allocation2 + $0x370] sm:$0xff] }
  0x37   :  { %1273 = vmatpush3.msra.mxu1 %v110_v48  ;;  %1240 = vmatpush3.msra.mxu0 %v77_v49  ;;  %v150_v14 = vld [vmem:[#allocation2 + $0x260] sm:$0xff]  ;;  %v165_v15 = vld [vmem:[#allocation2 + $0x2d8] sm:$0xff]  ;;  %v183_v16 = vld [vmem:[#allocation2 + $0x368] sm:$0xff] }
  0x38   :  { %1274 = vmatprep.subr.mxu1 %v125_v50  ;;  %1241 = vmatprep.subr.mxu0 %v92_v51  ;;  %v149_v17 = vld [vmem:[#allocation2 + $0x258] sm:$0xff]  ;;  %v164_v18 = vld [vmem:[#allocation2 + $0x2d0] sm:$0xff]  ;;  %v182_v19 = vld [vmem:[#allocation2 + $0x360] sm:$0xff] }
  0x39   :  { %1275 = vmatpush3.msra.mxu1 %v109_v52  ;;  %1242 = vmatpush3.msra.mxu0 %v76_v53  ;;  %v148_v20 = vld [vmem:[#allocation2 + $0x250] sm:$0xff]  ;;  %v163_v21 = vld [vmem:[#allocation2 + $0x2c8] sm:$0xff]  ;;  %v181_v22 = vld [vmem:[#allocation2 + $0x358] sm:$0xff] }
  0x3a   :  { %1276 = vmatprep.subr.mxu1 %v124_v54  ;;  %1243 = vmatprep.subr.mxu0 %v91_v55  ;;  %v147_v23 = vld [vmem:[#allocation2 + $0x248] sm:$0xff]  ;;  %v162_v24 = vld [vmem:[#allocation2 + $0x2c0] sm:$0xff]  ;;  %v180_v25 = vld [vmem:[#allocation2 + $0x350] sm:$0xff] }
  0x3b   :  { %1277 = vmatpush3.msra.mxu1 %v108_v56  ;;  %1244 = vmatpush3.msra.mxu0 %v75_v57  ;;  %v146_v26 = vld [vmem:[#allocation2 + $0x240] sm:$0xff]  ;;  %v161_v27 = vld [vmem:[#allocation2 + $0x2b8] sm:$0xff]  ;;  %v179_v28 = vld [vmem:[#allocation2 + $0x348] sm:$0xff] }
  0x3c   :  { %1278 = vmatprep.subr.mxu1 %v123_v58  ;;  %1245 = vmatprep.subr.mxu0 %v90_v59  ;;  %v145_v29 = vld [vmem:[#allocation2 + $0x238] sm:$0xff]  ;;  %v160_v30 = vld [vmem:[#allocation2 + $0x2b0] sm:$0xff]  ;;  %v178_v31 = vld [vmem:[#allocation2 + $0x340] sm:$0xff] }
  0x3d   :  { %257 = vmatprep.mubr.f32.mxu0 %v68_v60  ;;  %1246 = vmatpush3.msra.mxu0 %v74_v61  ;;  %v144_v32 = vld [vmem:[#allocation2 + $0x230] sm:$0xff]  ;;  %v159_v33 = vld [vmem:[#allocation2 + $0x2a8] sm:$0xff]  ;;  %v177_v34 = vld [vmem:[#allocation2 + $0x338] sm:$0xff] }
  0x3e   :  { %1279 = vmatpush3.msra.mxu1 %v107_v62  ;;  %258 = vmatmul.mubr.f32.vlgmr.msra.gmra.mxu0 %v67_v63  ;;  %v143_v35 = vld [vmem:[#allocation2 + $0x228] sm:$0xff]  ;;  %v158_v36 = vld [vmem:[#allocation2 + $0x2a0] sm:$0xff]  ;;  %v176_v37 = vld [vmem:[#allocation2 + $0x330] sm:$0xff] }
  0x3f   :  { %1280 = vmatprep.subr.mxu1 %v122_v0  ;;  %1285 = vmatprep.subr.mxu0 %v169_v1  ;;  %v142_v38 = vld [vmem:[#allocation2 + $0x220] sm:$0xff]  ;;  %v157_v39 = vld [vmem:[#allocation2 + $0x298] sm:$0xff]  ;;  %v175_v40 = vld [vmem:[#allocation2 + $0x328] sm:$0xff] }
  0x40   :  { %1281 = vmatpush3.msra.mxu1 %v106_v2  ;;  %327 = vmatprep.mubr.f32.mxu1 %v70_v3  ;;  %v141_v41 = vld [vmem:[#allocation2 + $0x218] sm:$0xff]  ;;  %v156_v42 = vld [vmem:[#allocation2 + $0x290] sm:$0xff]  ;;  %v174_v43 = vld [vmem:[#allocation2 + $0x320] sm:$0xff] }
  0x41   :  { %1286 = vmatpush3.msra.mxu0 %v153_v4  ;;  %328 = vmatmul.mubr.f32.vlgmr.msra.gmra.mxu1 %v69_v5  ;;  %v140_v44 = vld [vmem:[#allocation2 + $0x210] sm:$0xff]  ;;  %v155_v45 = vld [vmem:[#allocation2 + $0x288] sm:$0xff]  ;;  %v173_v46 = vld [vmem:[#allocation2 + $0x318] sm:$0xff] }
  0x42   :  { %1287 = vmatprep.subr.mxu0 %v168_v6  ;;  %1389 = vmatprep.subr.mxu1 %v1627_v11  ;;  %v139_v47 = vld [vmem:[#allocation2 + $0x208] sm:$0xff]  ;;  %v154_v48 = vld [vmem:[#allocation2 + $0x280] sm:$0xff]  ;;  %v172_v51 = vld [vmem:[#allocation2 + $0x310] sm:$0xff] }
  0x43   :  { %1288 = vmatpush3.msra.mxu0 %v152_v7  ;;  %1390 = vmatpush3.msra.mxu1 %v185_v9  ;;  %v72_v49 = vld [vmem:[%s1916_s0 + $0x28] sm:$0xff]  ;;  %v138_v50 = vld [vmem:[#allocation2 + $0x200] sm:$0xff]  ;;  %v73_v55 = vld [vmem:[%s1916_s0 + $0x30] sm:$0xff] }
  0x44   :  { %1289 = vmatprep.subr.mxu0 %v167_v8  ;;  %1391 = vmatprep.subr.mxu1 %v1627_v11  ;;  %v71_v52 = vld [vmem:[%s1916_s0 + $0x20] sm:$0xff]  ;;  %v171_v53 = vld [vmem:[#allocation2 + $0x308] sm:$0xff]  ;;  %v489_v56 = vld [vmem:[%s1919_s3 + $0x78] sm:$0xff] }
  0x45   :  { %1290 = vmatpush3.msra.mxu0 %v151_v10  ;;  %1392 = vmatpush3.msra.mxu1 %v184_v13  ;;  %v170_v54 = vld [vmem:[#allocation2 + $0x300] sm:$0xff]  ;;  %v488_v57 = vld [vmem:[%s1919_s3 + $0x70] sm:$0xff]  ;;  %v487_v58 = vld [vmem:[%s1919_s3 + $0x68] sm:$0xff] }
  0x46   :  { %1291 = vmatprep.subr.mxu0 %v166_v12  ;;  %1393 = vmatprep.subr.mxu1 %v1627_v11  ;;  %v486_v59 = vld [vmem:[%s1919_s3 + $0x60] sm:$0xff]  ;;  %v485_v60 = vld [vmem:[%s1919_s3 + $0x58] sm:$0xff]  ;;  %v484_v61 = vld [vmem:[%s1919_s3 + $0x50] sm:$0xff] }
  0x47   :  { %1292 = vmatpush3.msra.mxu0 %v150_v14  ;;  %1394 = vmatpush3.msra.mxu1 %v183_v16  ;;  %v483_v62 = vld [vmem:[%s1919_s3 + $0x48] sm:$0xff]  ;;  %v482_v63 = vld [vmem:[%s1919_s3 + $0x40] sm:$0xff]  ;;  %v481_v0 = vld [vmem:[%s1919_s3 + $0x38] sm:$0xff] }
  0x48   :  { %1293 = vmatprep.subr.mxu0 %v165_v15  ;;  %1395 = vmatprep.subr.mxu1 %v1627_v11  ;;  %v480_v1 = vld [vmem:[%s1919_s3 + $0x30] sm:$0xff]  ;;  %v479_v2 = vld [vmem:[%s1919_s3 + $0x28] sm:$0xff]  ;;  %v478_v3 = vld [vmem:[%s1919_s3 + $0x20] sm:$0xff] }
  0x49   :  { %1294 = vmatpush3.msra.mxu0 %v149_v17  ;;  %1396 = vmatpush3.msra.mxu1 %v182_v19  ;;  %v477_v4 = vld [vmem:[%s1919_s3 + $0x18] sm:$0xff]  ;;  %v476_v5 = vld [vmem:[%s1919_s3 + $0x10] sm:$0xff]  ;;  %v475_v6 = vld [vmem:[%s1919_s3 + $0x8] sm:$0xff] }
  0x4a   :  { %1295 = vmatprep.subr.mxu0 %v164_v18  ;;  %1397 = vmatprep.subr.mxu1 %v1627_v11  ;;  %v474_v7 = vld [vmem:[%s1919_s3] sm:$0xff]  ;;  %v575_v8 = vld [vmem:[%s1921_s5 + $0x38] sm:$0xff]  ;;  %v574_v9 = vld [vmem:[%s1921_s5 + $0x30] sm:$0xff] }
  0x4b   :  { %1296 = vmatpush3.msra.mxu0 %v148_v20  ;;  %1398 = vmatpush3.msra.mxu1 %v181_v22  ;;  %v573_v10 = vld [vmem:[%s1921_s5 + $0x28] sm:$0xff]  ;;  %v572_v12 = vld [vmem:[%s1921_s5 + $0x20] sm:$0xff]  ;;  %v571_v13 = vld [vmem:[%s1921_s5 + $0x18] sm:$0xff] }
  0x4c   :  { %1297 = vmatprep.subr.mxu0 %v163_v21  ;;  %1399 = vmatprep.subr.mxu1 %v1627_v11  ;;  %v1209_v18 = vld [vmem:[%s1918_s2] ss:$0 sm:$0xff] }
  0x4d   :  { %1298 = vmatpush3.msra.mxu0 %v147_v23  ;;  %1400 = vmatpush3.msra.mxu1 %v180_v25 }
  0x4e   :  { %1299 = vmatprep.subr.mxu0 %v162_v24  ;;  %1401 = vmatprep.subr.mxu1 %v1627_v11 }
  0x4f   :  { %1300 = vmatpush3.msra.mxu0 %v146_v26  ;;  %1402 = vmatpush3.msra.mxu1 %v179_v28 }
  0x50   :  { %1301 = vmatprep.subr.mxu0 %v161_v27  ;;  %1403 = vmatprep.subr.mxu1 %v1627_v11 }
  0x51   :  { %1302 = vmatpush3.msra.mxu0 %v145_v29  ;;  %1404 = vmatpush3.msra.mxu1 %v178_v31  ;;  %v570_v31 = vld [vmem:[%s1921_s5 + $0x10] sm:$0xff] }
  0x52   :  { %1303 = vmatprep.subr.mxu0 %v160_v30  ;;  %1405 = vmatprep.subr.mxu1 %v1627_v11 }
  0x53   :  { %1304 = vmatpush3.msra.mxu0 %v144_v32  ;;  %1406 = vmatpush3.msra.mxu1 %v177_v34  ;;  %v569_v32 = vld [vmem:[%s1921_s5 + $0x8] sm:$0xff]  ;;  %v1210_v34 = vld [vmem:[%s1920_s4] ss:$0 sm:$0xff] }
  0x54   :  { %1305 = vmatprep.subr.mxu0 %v159_v33  ;;  %1407 = vmatprep.subr.mxu1 %v1627_v11  ;;  %v568_v33 = vld [vmem:[%s1921_s5] sm:$0xff] }
  0x55   :  { %1306 = vmatpush3.msra.mxu0 %v143_v35  ;;  %1408 = vmatpush3.msra.mxu1 %v176_v37 }
  0x56   :  { %1307 = vmatprep.subr.mxu0 %v158_v36  ;;  %1409 = vmatprep.subr.mxu1 %v1627_v11 }
  0x57   :  { %1308 = vmatpush3.msra.mxu0 %v142_v38  ;;  %1410 = vmatpush3.msra.mxu1 %v175_v40  ;;  %v664_v40 = vld [vmem:[%s1923_s7 + $0x30] sm:$0xff] }
  0x58   :  { %1309 = vmatprep.subr.mxu0 %v157_v39  ;;  %1411 = vmatprep.subr.mxu1 %v1627_v11  ;;  %v665_v39 = vld [vmem:[%s1923_s7 + $0x38] sm:$0xff] }
  0x59   :  { %1310 = vmatpush3.msra.mxu0 %v141_v41  ;;  %1412 = vmatpush3.msra.mxu1 %v174_v43  ;;  %v663_v41 = vld [vmem:[%s1923_s7 + $0x28] sm:$0xff]  ;;  %v661_v43 = vld [vmem:[%s1923_s7 + $0x18] sm:$0xff] }
  0x5a   :  { %1311 = vmatprep.subr.mxu0 %v156_v42  ;;  %1413 = vmatprep.subr.mxu1 %v1627_v11  ;;  %v662_v42 = vld [vmem:[%s1923_s7 + $0x20] sm:$0xff] }
  0x5b   :  { %1312 = vmatpush3.msra.mxu0 %v140_v44  ;;  %1414 = vmatpush3.msra.mxu1 %v173_v46  ;;  %v660_v44 = vld [vmem:[%s1923_s7 + $0x10] sm:$0xff]  ;;  %v658_v46 = vld [vmem:[%s1923_s7] sm:$0xff] }
  0x5c   :  { %1313 = vmatprep.subr.mxu0 %v155_v45  ;;  %1415 = vmatprep.subr.mxu1 %v1627_v11  ;;  %v659_v45 = vld [vmem:[%s1923_s7 + $0x8] sm:$0xff] }
  0x5d   :  { %1314 = vmatpush3.msra.mxu0 %v139_v47  ;;  %397 = vmatprep.mubr.f32.mxu0 %v72_v49  ;;  %v853_v47 = vld [vmem:[#allocation5 + $0x350] sm:$0xff]  ;;  %v852_v49 = vld [vmem:[#allocation5 + $0x348] sm:$0xff] }
  0x5e   :  { %1315 = vmatprep.subr.mxu0 %v154_v48  ;;  %1416 = vmatpush3.msra.mxu1 %v172_v51  ;;  %v855_v48 = vld [vmem:[#allocation5 + $0x360] sm:$0xff]  ;;  %v845_v51 = vld [vmem:[#allocation5 + $0x310] sm:$0xff] }
  0x5f   :  { %1316 = vmatpush3.msra.mxu0 %v138_v50  ;;  %1417 = vmatprep.subr.mxu1 %v1627_v11  ;;  %v846_v50 = vld [vmem:[#allocation5 + $0x318] sm:$0xff] }
  0x60   :  { %398 = vmatmul.mubr.f32.vlgmr.msra.gmra.mxu0 %v71_v52  ;;  %1418 = vmatpush3.msra.mxu1 %v171_v53  ;;  %v839_v52 = vld [vmem:[#allocation5 + $0x2e0] sm:$0xff]  ;;  %v838_v53 = vld [vmem:[#allocation5 + $0x2d8] sm:$0xff] }
  0x61   :  { %1421 = vmatprep.mubr.msk.f32.mxu1 %vm1628_vm0, %v1627_v11  ;;  %1419 = vmatprep.subr.mxu1 %v1627_v11 }
  0x62   :  { %1424 = vmatprep.subr.mxu0 %v1627_v11  ;;  %1420 = vmatpush3.msra.mxu1 %v170_v54  ;;  %v832_v54 = vld [vmem:[#allocation5 + $0x2a8] sm:$0xff] }
  0x63   :  { %1456 = vmatprep.mubr.msk.f32.mxu0 %vm1628_vm0, %v1627_v11  ;;  %1422 = vmatmul.mubr.f32.vlgmr.msra.gmra.mxu1 %v73_v55  ;;  %v831_v55 = vld [vmem:[#allocation5 + $0x2a0] sm:$0xff] }
  0x64   :  { %1459 = vmatprep.subr.mxu1 %v1627_v11  ;;  %1475 = vmatprep.mubr.msk.f32.mxu1 %vm1628_vm0, %v1627_v11 }
  0x65   :  { %1425 = vmatpush3.msra.mxu0 %v489_v56  ;;  %1460 = vmatpush3.msra.mxu1 %v575_v8  ;;  %v825_v56 = vld [vmem:[#allocation5 + $0x270] sm:$0xff] }
  0x66   :  { %1426 = vmatprep.subr.mxu0 %v1627_v11  ;;  %1461 = vmatprep.subr.mxu1 %v1627_v11  ;;  %v769_v8 = vld [vmem:[#allocation5 + $0xb0] sm:$0xff] }
  0x67   :  { %1427 = vmatpush3.msra.mxu0 %v488_v57  ;;  %1462 = vmatpush3.msra.mxu1 %v574_v9  ;;  %v824_v57 = vld [vmem:[#allocation5 + $0x268] sm:$0xff] }
  0x68   :  { %1428 = vmatprep.subr.mxu0 %v1627_v11  ;;  %1463 = vmatprep.subr.mxu1 %v1627_v11  ;;  %v768_v9 = vld [vmem:[#allocation5 + $0xa8] sm:$0xff] }
  0x69   :  { %1429 = vmatpush3.msra.mxu0 %v487_v58  ;;  %1464 = vmatpush3.msra.mxu1 %v573_v10  ;;  %v818_v58 = vld [vmem:[#allocation5 + $0x238] sm:$0xff] }
  0x6a   :  { %1430 = vmatprep.subr.mxu0 %v1627_v11  ;;  %1465 = vmatprep.subr.mxu1 %v1627_v11  ;;  %v762_v10 = vld [vmem:[#allocation5 + $0x78] sm:$0xff] }
  0x6b   :  { %1431 = vmatpush3.msra.mxu0 %v486_v59  ;;  %1466 = vmatpush3.msra.mxu1 %v572_v12  ;;  %v817_v59 = vld [vmem:[#allocation5 + $0x230] sm:$0xff] }
  0x6c   :  { %1432 = vmatprep.subr.mxu0 %v1627_v11  ;;  %1467 = vmatprep.subr.mxu1 %v1627_v11  ;;  %v761_v12 = vld [vmem:[#allocation5 + $0x70] sm:$0xff] }
  0x6d   :  { %1433 = vmatpush3.msra.mxu0 %v485_v60  ;;  %1468 = vmatpush3.msra.mxu1 %v571_v13  ;;  %v811_v60 = vld [vmem:[#allocation5 + $0x200] sm:$0xff] }
  0x6e   :  { %1434 = vmatprep.subr.mxu0 %v1627_v11  ;;  %1469 = vmatprep.subr.mxu1 %v1627_v11  ;;  %v1211_v13 = vld [vmem:[%s1922_s6] ss:$0 sm:$0xff] }
  0x6f   :  { %1435 = vmatpush3.msra.mxu0 %v484_v61  ;;  %1470 = vmatpush3.msra.mxu1 %v570_v31  ;;  %v810_v61 = vld [vmem:[#allocation5 + $0x1f8] sm:$0xff] }
  0x70   :  { %1436 = vmatprep.subr.mxu0 %v1627_v11  ;;  %1471 = vmatprep.subr.mxu1 %v1627_v11  ;;  %v806_v31 = vld [vmem:[#allocation5 + $0x1d8] sm:$0xff] }
  0x71   :  { %1437 = vmatpush3.msra.mxu0 %v483_v62  ;;  %1472 = vmatpush3.msra.mxu1 %v569_v32  ;;  %v804_v62 = vld [vmem:[#allocation5 + $0x1c8] sm:$0xff]  ;;  %v805_v32 = vld [vmem:[#allocation5 + $0x1d0] sm:$0xff] }
  0x72   :  { %1438 = vmatprep.subr.mxu0 %v1627_v11  ;;  %1473 = vmatprep.subr.mxu1 %v1627_v11 }
  0x73   :  { %1439 = vmatpush3.msra.mxu0 %v482_v63  ;;  %1474 = vmatpush3.msra.mxu1 %v568_v33  ;;  %v803_v63 = vld [vmem:[#allocation5 + $0x1c0] sm:$0xff] }
  0x74   :  { %1440 = vmatprep.subr.mxu0 %v1627_v11  ;;  %1478 = vmatprep.subr.mxu1 %v1627_v11  ;;  %v799_v33 = vld [vmem:[#allocation5 + $0x1a0] sm:$0xff] }
  0x75   :  { %1441 = vmatpush3.msra.mxu0 %v481_v0  ;;  %v797_v0 = vld [vmem:[#allocation5 + $0x190] sm:$0xff] }
  0x76   :  { %1442 = vmatprep.subr.mxu0 %v1627_v11 }
  0x77   :  { %1443 = vmatpush3.msra.mxu0 %v480_v1  ;;  %v796_v1 = vld [vmem:[#allocation5 + $0x188] sm:$0xff] }
  0x78   :  { %1444 = vmatprep.subr.mxu0 %v1627_v11 }
  0x79   :  { %1445 = vmatpush3.msra.mxu0 %v479_v2  ;;  %v790_v2 = vld [vmem:[#allocation5 + $0x158] sm:$0xff] }
  0x7a   :  { %1446 = vmatprep.subr.mxu0 %v1627_v11 }
  0x7b   :  { %1447 = vmatpush3.msra.mxu0 %v478_v3  ;;  %v789_v3 = vld [vmem:[#allocation5 + $0x150] sm:$0xff] }
  0x7c   :  { %1448 = vmatprep.subr.mxu0 %v1627_v11 }
  0x7d   :  { %1449 = vmatpush3.msra.mxu0 %v477_v4  ;;  %v783_v4 = vld [vmem:[#allocation5 + $0x120] sm:$0xff] }
  0x7e   :  { %1450 = vmatprep.subr.mxu0 %v1627_v11 }
  0x7f   :  { %1451 = vmatpush3.msra.mxu0 %v476_v5  ;;  %v782_v5 = vld [vmem:[#allocation5 + $0x118] sm:$0xff] }
  0x80   :  { %1452 = vmatprep.subr.mxu0 %v1627_v11 }
  0x81   :  { %1453 = vmatpush3.msra.mxu0 %v475_v6  ;;  %v776_v6 = vld [vmem:[#allocation5 + $0xe8] sm:$0xff] }
  0x82   :  { %1454 = vmatprep.subr.mxu0 %v1627_v11 }
  0x83   :  { %1455 = vmatpush3.msra.mxu0 %v474_v7  ;;  %v775_v7 = vld [vmem:[#allocation5 + $0xe0] sm:$0xff] }
  0x84   :  { %896 = vmatprep.subr.mxu0 %v853_v47  ;;  %v754_v47 = vld [vmem:[#allocation5 + $0x38] sm:$0xff] }
  0xfe   :  { %v1247_v14 = vpop.f32.mrf.mxu0 }
 0x100   :  { %v1248_v15 = vpop.f32.mrf.mxu0 }
 0x101   :  { %v1282_v16 = vpop.f32.mrf.mxu1  ;;  %v1249_v17 = vadd.f32 %v1248_v15, %v1247_v14 }
 0x103   :  { %v1283_v19 = vpop.f32.mrf.mxu1  ;;  %v260_v20 = vadd.f32 %v1249_v17, %v1209_v18  ;;  %v854_v18 = vld [vmem:[#allocation5 + $0x358] sm:$0xff] }
 0x104   :  { %v1284_v21 = vadd.f32 %v1283_v19, %v1282_v16  ;;  %v848_v19 = vld [vmem:[#allocation5 + $0x328] sm:$0xff] }
 0x106   :  { %v330_v24 = vadd.f32 %v1284_v21, %v260_v20  ;;  %v847_v20 = vld [vmem:[#allocation5 + $0x320] sm:$0xff]  ;;  %v841_v21 = vld [vmem:[#allocation5 + $0x2f0] sm:$0xff] }
 0x120   :  { %v1317_v22 = vpop.f32.mrf.mxu0 }
 0x122   :  { %v1318_v23 = vpop.f32.mrf.mxu0 }
 0x123   :  { %v1319_v25 = vadd.f32 %v1318_v23, %v1317_v22  ;;  %v469_v26 = vpop.f32.mrf.mxu1  ;;  %v840_v22 = vld [vmem:[#allocation5 + $0x2e8] sm:$0xff]  ;;  %v834_v23 = vld [vmem:[#allocation5 + $0x2b8] sm:$0xff] }
 0x125   :  { %v400_v27 = vadd.f32 %v1319_v25, %v330_v24  ;;  %v1423_v28 = vpop.f32.mrf.mxu1  ;;  %v833_v24 = vld [vmem:[#allocation5 + $0x2b0] sm:$0xff]  ;;  %v827_v25 = vld [vmem:[#allocation5 + $0x280] sm:$0xff] }
 0x126   :  { %v819_v28 = vld [vmem:[#allocation5 + $0x240] sm:$0xff] }
 0x127   :  { %v470_v29 = vadd.f32 %v469_v26, %v400_v27  ;;  %v826_v26 = vld [vmem:[#allocation5 + $0x278] sm:$0xff]  ;;  %v820_v27 = vld [vmem:[#allocation5 + $0x248] sm:$0xff] }
 0x129   :  { %v473_v30 = vmax.f32 %v470_v29, 0.0  ;;  %v813_v29 = vld [vmem:[#allocation5 + $0x210] sm:$0xff] }
 0x12b   :  { %1457 = vmatmul.mubr.f32.vlgmr.msra.gmra.mxu0 %v473_v30  ;;  %v812_v30 = vld [vmem:[#allocation5 + $0x208] sm:$0xff] }
 0x12c   :  { %960 = vmatprep.mubr.f32.mxu0 %v1627_v11  ;;  %897 = vmatpush1.msra.mxu0 %v852_v49  ;;  %v748_v49 = vld [vmem:[#allocation5 + $0x8] sm:$0xff] }
 0x12d   :  { %898 = vmatprep.subr.mxu0 %v846_v50  ;;  %v750_v50 = vld [vmem:[#allocation5 + $0x18] sm:$0xff] }
 0x12e   :  { %899 = vmatpush1.msra.mxu0 %v845_v51  ;;  %v747_v51 = vld [vmem:[#allocation5] sm:$0xff] }
 0x12f   :  { %900 = vmatprep.subr.mxu0 %v839_v52  ;;  %v749_v52 = vld [vmem:[#allocation5 + $0x10] sm:$0xff] }
 0x130   :  { %901 = vmatpush1.msra.mxu0 %v838_v53  ;;  %v857_v53 = vld [vmem:[#allocation5 + $0x370] sm:$0xff] }
 0x131   :  { %902 = vmatprep.subr.mxu0 %v832_v54  ;;  %v1213_v54 = vld [vmem:[%s1924_s8] ss:$0 sm:$0xff] }
 0x132   :  { %903 = vmatpush1.msra.mxu0 %v831_v55 }
 0x133   :  { %904 = vmatprep.subr.mxu0 %v825_v56 }
 0x134   :  { %905 = vmatpush1.msra.mxu0 %v824_v57 }
 0x135   :  { %906 = vmatprep.subr.mxu0 %v818_v58 }
 0x136   :  { %907 = vmatpush1.msra.mxu0 %v817_v59  ;;  %v856_v59 = vld [vmem:[#allocation5 + $0x368] sm:$0xff] }
 0x137   :  { %908 = vmatprep.subr.mxu0 %v811_v60  ;;  %v858_v60 = vld [vmem:[#allocation5 + $0x378] sm:$0xff] }
 0x138   :  { %909 = vmatpush1.msra.mxu0 %v810_v61  ;;  %v850_v61 = vld [vmem:[#allocation5 + $0x338] sm:$0xff] }
 0x139   :  { %910 = vmatprep.subr.mxu0 %v804_v62  ;;  %v849_v62 = vld [vmem:[#allocation5 + $0x330] sm:$0xff] }
 0x13a   :  { %911 = vmatpush1.msra.mxu0 %v803_v63  ;;  %v851_v63 = vld [vmem:[#allocation5 + $0x340] sm:$0xff] }
 0x13b   :  { %912 = vmatprep.subr.mxu0 %v797_v0  ;;  %v843_v0 = vld [vmem:[#allocation5 + $0x300] sm:$0xff] }
 0x13c   :  { %913 = vmatpush1.msra.mxu0 %v796_v1  ;;  %v842_v1 = vld [vmem:[#allocation5 + $0x2f8] sm:$0xff] }
 0x13d   :  { %914 = vmatprep.subr.mxu0 %v790_v2  ;;  %v844_v2 = vld [vmem:[#allocation5 + $0x308] sm:$0xff] }
 0x13e   :  { %915 = vmatpush1.msra.mxu0 %v789_v3  ;;  %v836_v3 = vld [vmem:[#allocation5 + $0x2c8] sm:$0xff] }
 0x13f   :  { %916 = vmatprep.subr.mxu0 %v783_v4  ;;  %v835_v4 = vld [vmem:[#allocation5 + $0x2c0] sm:$0xff] }
 0x140   :  { %917 = vmatpush1.msra.mxu0 %v782_v5  ;;  %v837_v5 = vld [vmem:[#allocation5 + $0x2d0] sm:$0xff] }
 0x141   :  { %918 = vmatprep.subr.mxu0 %v776_v6  ;;  %v829_v6 = vld [vmem:[#allocation5 + $0x290] sm:$0xff] }
 0x142   :  { %919 = vmatpush1.msra.mxu0 %v775_v7  ;;  %v828_v7 = vld [vmem:[#allocation5 + $0x288] sm:$0xff] }
 0x143   :  { %920 = vmatprep.subr.mxu0 %v769_v8  ;;  %v830_v8 = vld [vmem:[#allocation5 + $0x298] sm:$0xff] }
 0x144   :  { %921 = vmatpush1.msra.mxu0 %v768_v9  ;;  %v822_v9 = vld [vmem:[#allocation5 + $0x258] sm:$0xff] }
 0x145   :  { %922 = vmatprep.subr.mxu0 %v762_v10  ;;  %v821_v10 = vld [vmem:[#allocation5 + $0x250] sm:$0xff] }
 0x146   :  { %923 = vmatpush1.msra.mxu0 %v761_v12  ;;  %v823_v12 = vld [vmem:[#allocation5 + $0x260] sm:$0xff] }
 0x1eb   :  { %v563_v35 = vpop.f32.mrf.mxu0 }
 0x1ec   :  { %v564_v36 = vadd.f32 %v1210_v34, %v563_v35  ;;  %v798_v34 = vld [vmem:[#allocation5 + $0x198] sm:$0xff]  ;;  %v792_v35 = vld [vmem:[#allocation5 + $0x168] sm:$0xff] }
 0x1ed   :  { %v1458_v37 = vpop.f32.mrf.mxu0 }
 0x1ee   :  { %v567_v38 = vmax.f32 %v564_v36, 0.0  ;;  %v791_v36 = vld [vmem:[#allocation5 + $0x160] sm:$0xff]  ;;  %v785_v37 = vld [vmem:[#allocation5 + $0x130] sm:$0xff] }
 0x1f0   :  { %1476 = vmatmul.mubr.msk.f32.vlgmr.msra.gmra.mxu1 %vm583_vm1, %v567_v38  ;;  %v784_v38 = vld [vmem:[#allocation5 + $0x128] sm:$0xff] }
 0x1f1   :  { %1479 = vmatpush3.msra.mxu1 %v665_v39  ;;  %1494 = vmatprep.mubr.msk.f32.mxu1 %vm1628_vm0, %v1627_v11  ;;  %v778_v39 = vld [vmem:[#allocation5 + $0xf8] sm:$0xff] }
 0x1f2   :  { %1480 = vmatprep.subr.mxu1 %v1627_v11 }
 0x1f3   :  { %1481 = vmatpush3.msra.mxu1 %v664_v40  ;;  %v777_v40 = vld [vmem:[#allocation5 + $0xf0] sm:$0xff] }
 0x1f4   :  { %1482 = vmatprep.subr.mxu1 %v1627_v11 }
 0x1f5   :  { %1483 = vmatpush3.msra.mxu1 %v663_v41  ;;  %v771_v41 = vld [vmem:[#allocation5 + $0xc0] sm:$0xff] }
 0x1f6   :  { %1484 = vmatprep.subr.mxu1 %v1627_v11 }
 0x1f7   :  { %1485 = vmatpush3.msra.mxu1 %v662_v42  ;;  %v770_v42 = vld [vmem:[#allocation5 + $0xb8] sm:$0xff] }
 0x1f8   :  { %1486 = vmatprep.subr.mxu1 %v1627_v11 }
 0x1f9   :  { %1487 = vmatpush3.msra.mxu1 %v661_v43  ;;  %v764_v43 = vld [vmem:[#allocation5 + $0x88] sm:$0xff] }
 0x1fa   :  { %1488 = vmatprep.subr.mxu1 %v1627_v11 }
 0x1fb   :  { %1489 = vmatpush3.msra.mxu1 %v660_v44  ;;  %v763_v44 = vld [vmem:[#allocation5 + $0x80] sm:$0xff] }
 0x1fc   :  { %1490 = vmatprep.subr.mxu1 %v1627_v11 }
 0x1fd   :  { %1491 = vmatpush3.msra.mxu1 %v659_v45  ;;  %v755_v45 = vld [vmem:[#allocation5 + $0x40] sm:$0xff] }
 0x1fe   :  { %1492 = vmatprep.subr.mxu1 %v1627_v11  ;;  %924 = vmatprep.subr.mxu0 %v755_v45 }
 0x1ff   :  { %1493 = vmatpush3.msra.mxu1 %v658_v46  ;;  %v757_v46 = vld [vmem:[#allocation5 + $0x50] sm:$0xff]  ;;  %925 = vmatpush1.msra.mxu0 %v754_v47  ;;  %v859_v47 = vld [vmem:[%s1926_s10] sm:$0xff]  ;;  %s1629_s10 = smov [#allocation7]  }
 0x200   :  { %967 = vmatprep.subr.mxu1 %v855_v48  ;;  %v756_v48 = vld [vmem:[#allocation5 + $0x48] sm:$0xff]  ;;  %926 = vmatprep.subr.mxu0 %v748_v49  ;;  %s1199_s24 = sshll.u32 %s1629_s10, 4  ;;  %s1200_s24 = int_to_ptr.vmem [resolvable:$true] %s1199_s24 }
 0x201   :  { %927 = vmatpush1.msra.mxu0 %v747_v51  ;;  %s1595_s2 = scalar_lea.vmem %s1200_s24, 896  ;;  %p1600_p11 = scmp.lt.s32.totalorder %s1200_s24, %s1200_s24 }
 0x202   :  { %1038 = vmatprep.subr.mxu0 %v857_v53  ;;  %p1596_p10 = scmp.ne.s32.totalorder %s1200_s24, %s1595_s2  ;;  %p1601_p12 = scmp.lt.s32.totalorder %s1595_s2, %s1595_s2 }
 0x204   :  { %p1602_p13 = por %p1601_p12, %p1600_p11 }
 0x206   :  { %p1603_p0 = pnand %p1602_p13, %p1596_p10 }
 0x2b0   :  { %v653_v14 = vpop.f32.mrf.mxu1 }
 0x2b1   :  { %v654_v15 = vadd.f32 %v1211_v13, %v653_v14  ;;  %v815_v13 = vld [vmem:[#allocation5 + $0x220] sm:$0xff]  ;;  %v814_v14 = vld [vmem:[#allocation5 + $0x218] sm:$0xff] }
 0x2b2   :  { %v1477_v16 = vpop.f32.mrf.mxu1 }
 0x2b3   :  { %v657_v17 = vmax.f32 %v654_v15, 0.0  ;;  %v816_v15 = vld [vmem:[#allocation5 + $0x228] sm:$0xff] }
 0x2b4   :  { %v808_v16 = vld [vmem:[#allocation5 + $0x1e8] sm:$0xff] }
 0x2b5   :  { %1495 = vmatmul.mubr.msk.f32.vlgmr.msra.gmra.mxu1 %vm583_vm1, %v657_v17  ;;  %v807_v17 = vld [vmem:[#allocation5 + $0x1e0] sm:$0xff] }
 0x2b6   :  { %968 = vmatpush1.msra.mxu1 %v854_v18  ;;  %1031 = vmatprep.mubr.f32.mxu1 %v1627_v11  ;;  %v809_v18 = vld [vmem:[#allocation5 + $0x1f0] sm:$0xff] }
 0x2b7   :  { %969 = vmatprep.subr.mxu1 %v848_v19  ;;  %v801_v19 = vld [vmem:[#allocation5 + $0x1b0] sm:$0xff] }
 0x2b8   :  { %970 = vmatpush1.msra.mxu1 %v847_v20  ;;  %v800_v20 = vld [vmem:[#allocation5 + $0x1a8] sm:$0xff] }
 0x2b9   :  { %971 = vmatprep.subr.mxu1 %v841_v21  ;;  %v802_v21 = vld [vmem:[#allocation5 + $0x1b8] sm:$0xff] }
 0x2ba   :  { %972 = vmatpush1.msra.mxu1 %v840_v22  ;;  %v794_v22 = vld [vmem:[#allocation5 + $0x178] sm:$0xff] }
 0x2bb   :  { %973 = vmatprep.subr.mxu1 %v834_v23  ;;  %v793_v23 = vld [vmem:[#allocation5 + $0x170] sm:$0xff] }
 0x2bc   :  { %974 = vmatpush1.msra.mxu1 %v833_v24  ;;  %v795_v24 = vld [vmem:[#allocation5 + $0x180] sm:$0xff] }
 0x2bd   :  { %975 = vmatprep.subr.mxu1 %v827_v25  ;;  %v787_v25 = vld [vmem:[#allocation5 + $0x140] sm:$0xff] }
 0x2be   :  { %976 = vmatpush1.msra.mxu1 %v826_v26  ;;  %v786_v26 = vld [vmem:[#allocation5 + $0x138] sm:$0xff] }
 0x2bf   :  { %977 = vmatprep.subr.mxu1 %v820_v27  ;;  %v788_v27 = vld [vmem:[#allocation5 + $0x148] sm:$0xff] }
 0x2c0   :  { %978 = vmatpush1.msra.mxu1 %v819_v28  ;;  %v780_v28 = vld [vmem:[#allocation5 + $0x108] sm:$0xff] }
 0x2c1   :  { %979 = vmatprep.subr.mxu1 %v813_v29  ;;  %v779_v29 = vld [vmem:[#allocation5 + $0x100] sm:$0xff] }
 0x2c2   :  { %980 = vmatpush1.msra.mxu1 %v812_v30  ;;  %v781_v30 = vld [vmem:[#allocation5 + $0x110] sm:$0xff] }
 0x2c3   :  { %981 = vmatprep.subr.mxu1 %v806_v31  ;;  %v773_v31 = vld [vmem:[#allocation5 + $0xd0] sm:$0xff] }
 0x2c4   :  { %982 = vmatpush1.msra.mxu1 %v805_v32  ;;  %v772_v32 = vld [vmem:[#allocation5 + $0xc8] sm:$0xff] }
 0x2c5   :  { %983 = vmatprep.subr.mxu1 %v799_v33  ;;  %v774_v33 = vld [vmem:[#allocation5 + $0xd8] sm:$0xff] }
 0x2c6   :  { %984 = vmatpush1.msra.mxu1 %v798_v34  ;;  %v766_v34 = vld [vmem:[#allocation5 + $0x98] sm:$0xff] }
 0x2c7   :  { %985 = vmatprep.subr.mxu1 %v792_v35  ;;  %v765_v35 = vld [vmem:[#allocation5 + $0x90] sm:$0xff] }
 0x2c8   :  { %986 = vmatpush1.msra.mxu1 %v791_v36  ;;  %v767_v36 = vld [vmem:[#allocation5 + $0xa0] sm:$0xff] }
 0x2c9   :  { %987 = vmatprep.subr.mxu1 %v785_v37  ;;  %v759_v37 = vld [vmem:[#allocation5 + $0x60] sm:$0xff] }
 0x2ca   :  { %988 = vmatpush1.msra.mxu1 %v784_v38  ;;  %v758_v38 = vld [vmem:[#allocation5 + $0x58] sm:$0xff] }
 0x2cb   :  { %989 = vmatprep.subr.mxu1 %v778_v39  ;;  %v760_v39 = vld [vmem:[#allocation5 + $0x68] sm:$0xff] }
 0x2cc   :  { %990 = vmatpush1.msra.mxu1 %v777_v40  ;;  %v752_v40 = vld [vmem:[#allocation5 + $0x28] sm:$0xff] }
 0x2cd   :  { %991 = vmatprep.subr.mxu1 %v771_v41  ;;  %v751_v41 = vld [vmem:[#allocation5 + $0x20] sm:$0xff] }
 0x2ce   :  { %992 = vmatpush1.msra.mxu1 %v770_v42  ;;  %v753_v42 = vld [vmem:[#allocation5 + $0x30] sm:$0xff] }
 0x2cf   :  { %993 = vmatprep.subr.mxu1 %v764_v43  ;;  %v861_v43 = vlaneseq }
 0x2d0   :  { %994 = vmatpush1.msra.mxu1 %v763_v44 }
 0x2d1   :  { %995 = vmatprep.subr.mxu1 %v757_v46  ;;  %v862_v44 = vshrl.u32 %v861_v43, 7 }
 0x2d2   :  { %996 = vmatpush1.msra.mxu1 %v756_v48 }
 0x2d3   :  { %997 = vmatprep.subr.mxu1 %v750_v50  ;;  %v863_v45 = vsub.s32 0, %v862_v44  ;;  %v871_v46 = vsub.s32 2, %v862_v44  ;;  %v867_v48 = vsub.s32 1, %v862_v44  ;;  %v875_v49 = vsub.s32 3, %v862_v44 }
 0x2d4   :  { %998 = vmatpush1.msra.mxu1 %v749_v52 }
 0x2d5   :  { %1497 = vmatprep.subr.mxu1 %v1627_v11  ;;  %v864_v50 = vrot.slane %v859_v47, %v863_v45  ;;  %v872_v51 = vrot.slane %v859_v47, %v871_v46  ;;  %v868_v52 = vrot.slane %v859_v47, %v867_v48  ;;  %v876_v53 = vrot.slane %v859_v47, %v875_v49 }
 0x375   :  { %v742_v55 = vpop.f32.mrf.mxu1 }
 0x376   :  { %v743_v56 = vadd.f32 %v1213_v54, %v742_v55 }
 0x377   :  { %v1496_v57 = vpop.f32.mrf.mxu1 }
 0x378   :  { %v1886_v58 = vmax.f32 %v743_v56, 0.0 }
 0x37a   :  { %961 = vmatmul.mubr.f32.vlgmr.msra.gmra.mxu0 %v1886_v58  ;;  %1032 = vmatmul.mubr.f32.vlgmr.msra.gmra.mxu1 %v1886_v58 }
 0x37b   :  { %1039 = vmatpush1.msra.mxu0 %v856_v59  ;;  %1498 = vmatpush3.msra.mxu1 %v858_v60 }
 0x37c   :  { %1040 = vmatprep.subr.mxu0 %v850_v61  ;;  %1499 = vmatprep.subr.mxu1 %v1627_v11 }
 0x37d   :  { %1041 = vmatpush1.msra.mxu0 %v849_v62  ;;  %1500 = vmatpush3.msra.mxu1 %v851_v63 }
 0x37e   :  { %1042 = vmatprep.subr.mxu0 %v843_v0  ;;  %1501 = vmatprep.subr.mxu1 %v1627_v11 }
 0x37f   :  { %1043 = vmatpush1.msra.mxu0 %v842_v1  ;;  %1502 = vmatpush3.msra.mxu1 %v844_v2  ;;  %v879_v1 = vsub.s32 4, %v862_v44  ;;  %v887_v2 = vsub.s32 6, %v862_v44 }
 0x380   :  { %1044 = vmatprep.subr.mxu0 %v836_v3  ;;  %1503 = vmatprep.subr.mxu1 %v1627_v11  ;;  %v883_v3 = vsub.s32 5, %v862_v44 }
 0x381   :  { %1045 = vmatpush1.msra.mxu0 %v835_v4  ;;  %1504 = vmatpush3.msra.mxu1 %v837_v5  ;;  %v880_v4 = vrot.slane %v859_v47, %v879_v1  ;;  %v888_v5 = vrot.slane %v859_v47, %v887_v2 }
 0x382   :  { %1046 = vmatprep.subr.mxu0 %v829_v6  ;;  %1505 = vmatprep.subr.mxu1 %v1627_v11  ;;  %v884_v6 = vrot.slane %v859_v47, %v883_v3 }
 0x383   :  { %1047 = vmatpush1.msra.mxu0 %v828_v7  ;;  %1506 = vmatpush3.msra.mxu1 %v830_v8 }
 0x384   :  { %1048 = vmatprep.subr.mxu0 %v822_v9  ;;  %1507 = vmatprep.subr.mxu1 %v1627_v11 }
 0x385   :  { %1049 = vmatpush1.msra.mxu0 %v821_v10  ;;  %1508 = vmatpush3.msra.mxu1 %v823_v12 }
 0x386   :  { %1050 = vmatprep.subr.mxu0 %v815_v13  ;;  %1509 = vmatprep.subr.mxu1 %v1627_v11 }
 0x387   :  { %1051 = vmatpush1.msra.mxu0 %v814_v14  ;;  %1510 = vmatpush3.msra.mxu1 %v816_v15 }
 0x388   :  { %1052 = vmatprep.subr.mxu0 %v808_v16  ;;  %1511 = vmatprep.subr.mxu1 %v1627_v11 }
 0x389   :  { %1053 = vmatpush1.msra.mxu0 %v807_v17  ;;  %1512 = vmatpush3.msra.mxu1 %v809_v18 }
 0x38a   :  { %1054 = vmatprep.subr.mxu0 %v801_v19  ;;  %1513 = vmatprep.subr.mxu1 %v1627_v11 }
 0x38b   :  { %1055 = vmatpush1.msra.mxu0 %v800_v20  ;;  %1514 = vmatpush3.msra.mxu1 %v802_v21 }
 0x38c   :  { %1056 = vmatprep.subr.mxu0 %v794_v22  ;;  %1515 = vmatprep.subr.mxu1 %v1627_v11 }
 0x38d   :  { %1057 = vmatpush1.msra.mxu0 %v793_v23  ;;  %1516 = vmatpush3.msra.mxu1 %v795_v24 }
 0x38e   :  { %1058 = vmatprep.subr.mxu0 %v787_v25  ;;  %1517 = vmatprep.subr.mxu1 %v1627_v11 }
 0x38f   :  { %1059 = vmatpush1.msra.mxu0 %v786_v26  ;;  %1518 = vmatpush3.msra.mxu1 %v788_v27 }
 0x390   :  { %1060 = vmatprep.subr.mxu0 %v780_v28  ;;  %1519 = vmatprep.subr.mxu1 %v1627_v11 }
 0x391   :  { %1061 = vmatpush1.msra.mxu0 %v779_v29  ;;  %1520 = vmatpush3.msra.mxu1 %v781_v30 }
 0x392   :  { %1062 = vmatprep.subr.mxu0 %v773_v31  ;;  %1521 = vmatprep.subr.mxu1 %v1627_v11 }
 0x393   :  { %1063 = vmatpush1.msra.mxu0 %v772_v32  ;;  %1522 = vmatpush3.msra.mxu1 %v774_v33 }
 0x394   :  { %1064 = vmatprep.subr.mxu0 %v766_v34  ;;  %1523 = vmatprep.subr.mxu1 %v1627_v11 }
 0x395   :  { %1065 = vmatpush1.msra.mxu0 %v765_v35  ;;  %1524 = vmatpush3.msra.mxu1 %v767_v36 }
 0x396   :  { %1066 = vmatprep.subr.mxu0 %v759_v37  ;;  %1525 = vmatprep.subr.mxu1 %v1627_v11 }
 0x397   :  { %1067 = vmatpush1.msra.mxu0 %v758_v38  ;;  %1526 = vmatpush3.msra.mxu1 %v760_v39 }
 0x398   :  { %1068 = vmatprep.subr.mxu0 %v752_v40  ;;  %1527 = vmatprep.subr.mxu1 %v1627_v11 }
 0x399   :  { %1069 = vmatpush1.msra.mxu0 %v751_v41  ;;  %1102 = vmatprep.mubr.f32.mxu0 %v1627_v11 }
 0x39a   :  { %1528 = vmatpush3.msra.mxu1 %v753_v42  ;;  %1529 = vmatprep.mubr.msk.f32.mxu1 %vm1628_vm0, %v1627_v11 }
 0x39b   :  { %1103 = vmatmul.mubr.f32.vlgmr.msra.gmra.mxu0 %v1886_v58  ;;  %1530 = vmatmul.mubr.f32.vlgmr.msra.gmra.mxu1 %v1886_v58 }
 0x43a   :  { %v962_v54 = vpop.f32.mrf.mxu0  ;;  %v1033_v11 = vpop.f32.mrf.mxu1 }
 0x43b   :  { %v963_v55 = vadd.f32 %v962_v54, %v864_v50  ;;  %v1034_v56 = vadd.f32 %v1033_v11, %v872_v51 }
 0x43c   :  { %v964_v57 = vpop.f32.mrf.mxu0  ;;  %v1035_v58 = vpop.f32.mrf.mxu1 }
 0x43d   :  { %1541 = vtanh.f32 %v963_v55  ;;  %v965_v59 = vadd.f32 %v964_v57, %v868_v52  ;;  %v1036_v60 = vadd.f32 %v1035_v58, %v876_v53 }
 0x43e   :  { %1543 = vtanh.f32 %v1034_v56 }
 0x43f   :  { %1545 = vtanh.f32 %v965_v59 }
 0x440   :  { %1547 = vtanh.f32 %v1036_v60 }
 0x44a   :  { %v1542_v61 = vpop.eup %1541 }
 0x44b   :  { %v1544_v62 = vpop.eup %1543  ;;  %1186 = vst [vmem:[#allocation7] sm:$0xff] %v1542_v61 }
 0x44c   :  { %v1546_v63 = vpop.eup %1545  ;;  %1188 = vst [vmem:[#allocation7 + $0x10] sm:$0xff] %v1544_v62 }
 0x44d   :  { %v1548_v0 = vpop.eup %1547  ;;  %1187 = vst [vmem:[#allocation7 + $0x8] sm:$0xff] %v1546_v63 }
 0x44e   :  { %1189 = vst [vmem:[#allocation7 + $0x18] sm:$0xff] %v1548_v0 }
 0x45b   :  { %v1104_v7 = vpop.f32.mrf.mxu0  ;;  %v1175_v8 = vpop.f32.mrf.mxu1 }
 0x45c   :  { %v1105_v9 = vadd.f32 %v1104_v7, %v880_v4  ;;  %v1176_v10 = vadd.f32 %v1175_v8, %v888_v5 }
 0x45d   :  { %v1106_v12 = vpop.f32.mrf.mxu0  ;;  %v1531_v13 = vpop.f32.mrf.mxu1 }
 0x45e   :  { %1549 = vtanh.f32 %v1105_v9  ;;  %v1107_v14 = vadd.f32 %v1106_v12, %v884_v6 }
 0x45f   :  { %1551 = vtanh.f32 %v1176_v10 }
 0x460   :  { %1553 = vtanh.f32 %v1107_v14 }
 0x46b   :  { %v1550_v15 = vpop.eup %1549 }
 0x46c   :  { %v1552_v16 = vpop.eup %1551  ;;  %1190 = vst [vmem:[#allocation7 + $0x20] sm:$0xff] %v1550_v15 }
 0x46d   :  { %v1554_v17 = vpop.eup %1553  ;;  %1192 = vst [vmem:[#allocation7 + $0x30] sm:$0xff] %v1552_v16 }
 0x46e   :  { %1191 = vst [vmem:[#allocation7 + $0x28] sm:$0xff] %v1554_v17 }
 0x46f   :  { %1606 = shalt.err (!%p1603_p0)
}
 0x470   :  { %1202 = dma.vmem_to_hbm [thread:$0]  %s1200_s24, 896, %s1927_s11, [#allocation4]  }
 0x471   :  { %1619 = dma.done.wait [#allocation4], 896  }
 0x472   :  { %1620 = vsyncadd [#allocation4], 4294966400 }
 0x473   :  { %1206 = vsyncpa [#allocation3], 1 }
 0x474   :  { %1207 = vsyncpa [#allocation6], 1 }
 0x475   :  { %1208 = vsyncpa [#allocation4], 1 }

</bundles_post_ra>
